<compile_context>
chip_gen: v6e
topology: v6e:2x2x1
jax: 0.10.0
libtpu: 0.0.40
codegen_flags: <defaults>
</compile_context>

<pallas_src>
import functools

import jax
import jax.numpy as jnp
from jax import lax
from jax.experimental import pallas as pl
from jax.experimental.pallas import tpu as pltpu


# ----------------------------- Tiled linear projection -----------------------------

def _linear_kernel(x_ref, w_ref, b_ref, o_ref):
    # x_ref: (tm, Din), w_ref: (Din, Dout) (pre-transposed), b_ref: (1, Dout), o_ref: (tm, Dout)
    o_ref[...] = (
        jnp.dot(x_ref[...], w_ref[...], preferred_element_type=jnp.float32)
        + b_ref[...]
    ).astype(o_ref.dtype)


def linear(x2d, w_t, b2, *, tm=256):
    """x2d: (M, Din); w_t: (Din, Dout) already transposed; b2: (1, Dout) -> (M, Dout)."""
    M, Din = x2d.shape
    Dout = w_t.shape[1]
    tm = min(tm, M)
    return pl.pallas_call(
        _linear_kernel,
        out_shape=jax.ShapeDtypeStruct((M, Dout), x2d.dtype),
        grid=(pl.cdiv(M, tm),),
        in_specs=[
            pl.BlockSpec((tm, Din), lambda i: (i, 0)),
            pl.BlockSpec((Din, Dout), lambda i: (0, 0)),   # weight resident across M tiles
            pl.BlockSpec((1, Dout), lambda i: (0, 0)),
        ],
        out_specs=pl.BlockSpec((tm, Dout), lambda i: (i, 0)),
        compiler_params=pltpu.CompilerParams(
            dimension_semantics=("parallel",),
            vmem_limit_bytes=32 * 1024 * 1024,
        ),
    )(x2d, w_t, b2)


# ------------------- Fused multi-head attention + output projection -------------------

def _attn_proj_kernel(q_ref, kv_ref, wp_ref, bp_ref, o_ref, *, num_heads, head_dim):
    # q_ref : (1, tq, dim)      scaled-Q (softmax scale folded into Wq/bq)
    # kv_ref: (1, Nk, 2*dim)    fused [K | V] projection of y
    # wp_ref: (dim, dim)        output-projection weight, already (Din, Dout)
    # bp_ref: (1, dim)
    # o_ref : (1, tq, dim)
    dim = num_heads * head_dim
    q = q_ref[0]                 # (tq, dim)   merged-head, lane-dense
    kv = kv_ref[0]               # (Nk, 2*dim)
    tq = q.shape[0]

    acc = jnp.zeros((tq, dim), jnp.float32)
    for h in range(num_heads):                       # static unroll over heads
        lo, hi = h * head_dim, (h + 1) * head_dim
        qh = q[:, lo:hi]                             # (tq, hd)
        kh = kv[:, lo:hi]                            # (Nk, hd)
        vh = kv[:, dim + lo:dim + hi]                # (Nk, hd)

        # scores = q_h @ k_h^T (contract over hd, no explicit transpose); scale pre-folded.
        s = lax.dot_general(qh, kh, (((1,), (1,)), ((), ())),
                            preferred_element_type=jnp.float32)          # (tq, Nk)
        m = jnp.max(s, axis=-1, keepdims=True)
        p = jnp.exp(s - m)                                                # f32 softmax
        l = jnp.sum(p, axis=-1, keepdims=True)
        oh = jnp.dot(p.astype(vh.dtype), vh,
                     preferred_element_type=jnp.float32)                  # (tq, hd)
        oh = oh * pl.reciprocal(l, approx=True)                           # EUP reciprocal

        # Fuse the output projection: o[:, lo:hi] @ Wp^T[lo:hi, :] accumulated in f32.
        acc = acc + jnp.dot(oh.astype(wp_ref.dtype), wp_ref[lo:hi, :],
                            preferred_element_type=jnp.float32)

    o_ref[0] = (acc + bp_ref[...]).astype(o_ref.dtype)


def attention_proj(q, kv, wp_t, bp2, num_heads, *, tq=128):
    """q: (B, Nq, dim) scaled; kv: (B, Nk, 2*dim); returns proj(attn) of shape (B, Nq, dim)."""
    B, Nq, dim = q.shape
    Nk = kv.shape[1]
    head_dim = dim // num_heads
    tq = min(tq, Nq)
    kern = functools.partial(_attn_proj_kernel, num_heads=num_heads, head_dim=head_dim)
    return pl.pallas_call(
        kern,
        out_shape=jax.ShapeDtypeStruct((B, Nq, dim), q.dtype),
        grid=(B, pl.cdiv(Nq, tq)),
        in_specs=[
            pl.BlockSpec((1, tq, dim), lambda b, qi: (b, qi, 0)),
            pl.BlockSpec((1, Nk, 2 * dim), lambda b, qi: (b, 0, 0)),
            pl.BlockSpec((dim, dim), lambda b, qi: (0, 0)),   # Wp resident
            pl.BlockSpec((1, dim), lambda b, qi: (0, 0)),
        ],
        out_specs=pl.BlockSpec((1, tq, dim), lambda b, qi: (b, qi, 0)),
        compiler_params=pltpu.CompilerParams(
            dimension_semantics=("parallel", "parallel"),
            vmem_limit_bytes=32 * 1024 * 1024,
        ),
    )(q, kv, wp_t, bp2)


# ----------------------------- Module wrapper -----------------------------

class CrossAttentionPallas:
    def __init__(self, dim, num_heads=8, dropout=0.1, key=None):
        self.dim = dim
        self.num_heads = num_heads
        self.scale = (dim // num_heads) ** (-0.5)
        self.dropout = dropout  # eval mode -> identity

        if key is None:
            key = jax.random.PRNGKey(0)
        keys = jax.random.split(key, 8)
        bound = 1.0 / (dim ** 0.5)  # nn.Linear default init range

        def init_w(k):
            return jax.random.uniform(k, (dim, dim), jnp.float32, -bound, bound)

        def init_b(k):
            return jax.random.uniform(k, (dim,), jnp.float32, -bound, bound)

        # Raw torch-layout params (kept for the pure-JAX reference).
        self.wq, self.bq = init_w(keys[0]), init_b(keys[1])
        self.wk, self.bk = init_w(keys[2]), init_b(keys[3])
        self.wv, self.bv = init_w(keys[4]), init_b(keys[5])
        self.wp, self.bp = init_w(keys[6]), init_b(keys[7])

        # Kernel-ready params: transposed once, scale folded into Q, K|V fused.
        self.wq_t = jnp.transpose(self.wq) * self.scale          # (dim, dim)
        self.bq_s = (self.bq * self.scale).reshape(1, dim)        # (1, dim)
        self.wkv_t = jnp.concatenate(
            [jnp.transpose(self.wk), jnp.transpose(self.wv)], axis=1)   # (dim, 2*dim)
        self.bkv = jnp.concatenate([self.bk, self.bv]).reshape(1, 2 * dim)
        self.wp_t = jnp.transpose(self.wp)                        # (dim, dim)
        self.bp2 = self.bp.reshape(1, dim)

    def __call__(self, x, y):
        # x: (B, Nq, dim), y: (B, Nk, dim)
        B, Nq, dim = x.shape
        Nk = y.shape[1]

        # Scaled Q projection of x; fused K|V projection of y (both tiled over rows).
        q = linear(x.reshape(B * Nq, dim), self.wq_t, self.bq_s).reshape(B, Nq, dim)
        kv = linear(y.reshape(B * Nk, dim), self.wkv_t, self.bkv).reshape(B, Nk, 2 * dim)

        # Attention + output projection fused, merged-head layout (no transposes, no
        # (B, Nq, dim) intermediate in HBM). Dropout is identity in eval mode.
        return attention_proj(q, kv, self.wp_t, self.bp2, self.num_heads)


# ----------------------------- Reference (pure JAX) -----------------------------

def _reference(mod, x, y):
    B, Nq, dim = x.shape
    Nk = y.shape[1]
    H, hd = mod.num_heads, dim // mod.num_heads
    q = (x @ mod.wq.T + mod.bq).reshape(B, Nq, H, hd).transpose(0, 2, 1, 3)
    k = (y @ mod.wk.T + mod.bk).reshape(B, Nk, H, hd).transpose(0, 2, 1, 3)
    v = (y @ mod.wv.T + mod.bv).reshape(B, Nk, H, hd).transpose(0, 2, 1, 3)
    s = jnp.einsum("bhqd,bhkd->bhqk", q, k) * mod.scale
    p = jax.nn.softmax(s, axis=-1)
    o = jnp.einsum("bhqk,bhkd->bhqd", p, v).transpose(0, 2, 1, 3).reshape(B, Nq, dim)
    return o @ mod.wp.T + mod.bp


# ----------------------------- Main -----------------------------

if __name__ == "__main__":
    key = jax.random.PRNGKey(0)
    kx, ky, kp = jax.random.split(key, 3)

    B, Nq, Nk, dim, heads = 2, 16, 8, 32, 8
    x = jax.random.normal(kx, (B, Nq, dim), jnp.float32)
    y = jax.random.normal(ky, (B, Nk, dim), jnp.float32)

    mod = CrossAttentionPallas(dim, num_heads=heads, dropout=0.1, key=kp)

    out = mod(x, y)
    out = jax.block_until_ready(out)

    ref = _reference(mod, x, y)
    assert out.shape == (B, Nq, dim)
    # approx=True reciprocal in the softmax -> allow a slightly looser tolerance.
    assert jnp.allclose(out, ref, atol=2e-3, rtol=2e-3), "mismatch vs reference"

    print("KERNEL_OK")
</pallas_src>

<mosaic_0001>
module attributes {stable_mosaic.version = 11 : i64} {
  func.func @_linear_kernel(%arg0: i32, %arg1: memref<32x32xf32, #tpu.memory_space<vmem>>, %arg2: memref<32x32xf32, #tpu.memory_space<vmem>>, %arg3: memref<1x32xf32, #tpu.memory_space<vmem>>, %arg4: memref<32x32xf32, #tpu.memory_space<vmem>>) attributes {dimension_semantics = [#tpu.dimension_semantics<parallel>], iteration_bounds = array<i64: 1>, scalar_prefetch = 0 : i64, scratch_operands = 0 : i64, tpu.core_type = #tpu.core_type<tc>, window_params = [{transform_indices = @transform_0, window_bounds = array<i64: 32, 32>}, {pipeline_mode = #tpu.pipeline_mode<synchronous>, transform_indices = @transform_1, window_bounds = array<i64: 32, 32>}, {pipeline_mode = #tpu.pipeline_mode<synchronous>, transform_indices = @transform_2, window_bounds = array<i64: 1, 32>}, {transform_indices = @transform_3, window_bounds = array<i64: 32, 32>}]} {
    %c0 = arith.constant 0 : index
    %c0_0 = arith.constant 0 : index
    %0 = vector.load %arg1[%c0, %c0_0] : memref<32x32xf32, #tpu.memory_space<vmem>>, vector<32x32xf32>
    %c0_1 = arith.constant 0 : index
    %c0_2 = arith.constant 0 : index
    %1 = vector.load %arg2[%c0_1, %c0_2] : memref<32x32xf32, #tpu.memory_space<vmem>>, vector<32x32xf32>
    %cst = arith.constant dense<0.000000e+00> : vector<32x32xf32>
    %2 = tpu.matmul %0, %1, %cst {dimension_numbers = #tpu.dot_dimension_numbers<[1], [0], [0], [1], [0, 0, 1, 1], [], []>} : vector<32x32xf32>, vector<32x32xf32>, vector<32x32xf32> -> vector<32x32xf32>
    %c0_3 = arith.constant 0 : index
    %c0_4 = arith.constant 0 : index
    %3 = vector.load %arg3[%c0_3, %c0_4] : memref<1x32xf32, #tpu.memory_space<vmem>>, vector<1x32xf32>
    %4 = vector.broadcast %3 : vector<1x32xf32> to vector<32x32xf32>
    %5 = arith.addf %2, %4 : vector<32x32xf32>
    %c0_5 = arith.constant 0 : index
    %c0_6 = arith.constant 0 : index
    %6 = vector.load %arg4[%c0_5, %c0_6] : memref<32x32xf32, #tpu.memory_space<vmem>>, vector<32x32xf32>
    tpu.vector_store %arg4[%c0_5, %c0_6], %5 {strides = array<i32>} : memref<32x32xf32, #tpu.memory_space<vmem>>, vector<32x32xf32>,
    return
  }
  func.func @transform_0(%arg0: i32) -> (i32, i32) {
    %c0_i32 = arith.constant 0 : i32
    %c0_i32_0 = arith.constant 0 : i32
    return %arg0, %c0_i32 : i32, i32
  }
  func.func @transform_1(%arg0: i32) -> (i32, i32) {
    %c0_i32 = arith.constant 0 : i32
    %c0_i32_0 = arith.constant 0 : i32
    %c0_i32_1 = arith.constant 0 : i32
    return %c0_i32, %c0_i32_0 : i32, i32
  }
  func.func @transform_2(%arg0: i32) -> (i32, i32) {
    %c0_i32 = arith.constant 0 : i32
    %c0_i32_0 = arith.constant 0 : i32
    %c0_i32_1 = arith.constant 0 : i32
    return %c0_i32, %c0_i32_0 : i32, i32
  }
  func.func @transform_3(%arg0: i32) -> (i32, i32) {
    %c0_i32 = arith.constant 0 : i32
    %c0_i32_0 = arith.constant 0 : i32
    return %arg0, %c0_i32 : i32, i32
  }
}

</mosaic_0001>

<bundles_post_ra>
// kernel: tpu_custom_call.1
= control target key start
LH: loop header
LB: loop body
LE: loop exit
PB: predicated region body
PF: predicated region fallthrough
CT: control target
= control target key end

     0   :  { %8 = vsyncpa [#allocation3], 0  ;;  %s338_s0 = inlined_call_operand.hbm [shape: f32[32,32], index: 0, kind: input, shape index: {}]   ;;  %s339_s1 = inlined_call_operand.hbm [shape: f32[32,32], index: 1, kind: input, shape index: {}]   ;;  %s340_s2 = inlined_call_operand.vmem [shape: f32[1,32], index: 2, kind: input, shape index: {}]   ;;  %s341_s3 = inlined_call_operand.hbm [shape: f32[32,32], index: 3, kind: output, shape index: {}]  }
   0x1   :  { %9 = vsyncpa [#allocation6], 0 }
   0x2   :  { %10 = vsyncpa [#allocation4], 0  ;;  %s284_s12 = smov [#allocation2]  }
   0x3   :  { %s16_s13 = sshll.u32 %s284_s12, 4  ;;  %s17_s13 = int_to_ptr.vmem [resolvable:$true] %s16_s13 }
   0x4   :  { %s226_s14 = scalar_lea.vmem %s17_s13, 512  ;;  %p231_p1 = scmp.lt.s32.totalorder %s17_s13, %s17_s13 }
   0x5   :  { %p227_p0 = scmp.ne.s32.totalorder %s17_s13, %s226_s14  ;;  %p232_p2 = scmp.lt.s32.totalorder %s226_s14, %s226_s14 }
   0x7   :  { %p233_p3 = por %p232_p2, %p231_p1 }
   0x9   :  { %p234_p4 = pnand %p233_p3, %p227_p0 }
   0xb   :  { %237 = shalt.err (!%p234_p4)
}
   0xc   :  { %s285_s15 = smov 128   ;;  %s286_s16 = smov 8  }
   0xd   :  { %22 = dma.hbm_to_vmem [thread:$0]  %s338_s0, 512, %s17_s13, [#allocation3], %s285_s15, %s285_s15, %s286_s16  }
   0xe   :  { %s287_s19 = smov [#allocation5]  }
   0xf   :  { %s28_s20 = sshll.u32 %s287_s19, 4  ;;  %s29_s20 = int_to_ptr.vmem [resolvable:$true] %s28_s20 }
  0x10   :  { %s246_s21 = scalar_lea.vmem %s29_s20, 512  ;;  %p251_p6 = scmp.lt.s32.totalorder %s29_s20, %s29_s20 }
  0x11   :  { %p247_p5 = scmp.ne.s32.totalorder %s29_s20, %s246_s21  ;;  %p252_p7 = scmp.lt.s32.totalorder %s246_s21, %s246_s21 }
  0x13   :  { %p253_p8 = por %p252_p7, %p251_p6 }
  0x15   :  { %p254_p9 = pnand %p253_p8, %p247_p5 }
  0x17   :  { %257 = shalt.err (!%p254_p9)
}
  0x18   :  { %34 = dma.hbm_to_vmem [thread:$0]  %s339_s1, 512, %s29_s20, [#allocation6], %s285_s15, %s285_s15, %s286_s16  }
  0x19   :  { %278 = dma.done.wait [#allocation3], 512  }
  0x1a   :  { %279 = vsyncadd [#allocation3], 4294966784 }
  0x1b   :  { %280 = dma.done.wait [#allocation6], 512  }
  0x1c   :  { %281 = vsyncadd [#allocation6], 4294966784  ;;  %v50_v0 = vld [vmem:[#allocation5 + $0x18] sm:$0xff]  ;;  %v49_v1 = vld [vmem:[#allocation5 + $0x10] sm:$0xff]  ;;  %vm58_vm0 = vcmask 261120   ;;  %s288_s24 = smov [#allocation7]  }
  0x1d   :  { %191 = vmatprep.subr.mxu0 %v50_v0  ;;  %205 = vmatprep.subr.mxu1 %v50_v0  ;;  %v48_v2 = vld [vmem:[#allocation5 + $0x8] sm:$0xff]  ;;  %v47_v3 = vld [vmem:[#allocation5] sm:$0xff]  ;;  %v45_v5 = vld [vmem:[#allocation2 + $0x10] sm:$0xff]  ;;  %s165_s25 = sshll.u32 %s288_s24, 4  ;;  %s166_s25 = int_to_ptr.vmem [resolvable:$true] %s165_s25 }
  0x1e   :  { %192 = vmatpush3.msra.mxu0 %v50_v0  ;;  %209 = vmatpush3.msra.mxu1 %v50_v0  ;;  %v43_v4 = vld [vmem:[#allocation2] sm:$0xff]  ;;  %v44_v6 = vld [vmem:[#allocation2 + $0x8] sm:$0xff]  ;;  %v46_v7 = vld [vmem:[#allocation2 + $0x18] sm:$0xff]  ;;  %p263_p11 = scmp.lt.s32.totalorder %s166_s25, %s166_s25 }
  0x1f   :  { %193 = vmatprep.subr.mxu0 %v49_v1  ;;  %206 = vmatprep.subr.mxu1 %v49_v1  ;;  %v178_v8 = vld [vmem:[%s340_s2] ss:$0 sm:$0xff]  ;;  %s258_s2 = scalar_lea.vmem %s166_s25, 512 }
  0x20   :  { %194 = vmatpush3.msra.mxu0 %v49_v1  ;;  %210 = vmatpush3.msra.mxu1 %v49_v1  ;;  %p259_p10 = scmp.ne.s32.totalorder %s166_s25, %s258_s2  ;;  %p264_p12 = scmp.lt.s32.totalorder %s258_s2, %s258_s2 }
  0x21   :  { %195 = vmatprep.subr.mxu0 %v48_v2  ;;  %207 = vmatprep.subr.mxu1 %v48_v2 }
  0x22   :  { %196 = vmatpush3.msra.mxu0 %v48_v2  ;;  %211 = vmatpush3.msra.mxu1 %v48_v2  ;;  %p265_p13 = por %p264_p12, %p263_p11 }
  0x23   :  { %197 = vmatprep.subr.mxu0 %v47_v3  ;;  %208 = vmatprep.subr.mxu1 %v47_v3 }
  0x24   :  { %198 = vmatpush3.msra.mxu0 %v47_v3  ;;  %212 = vmatpush3.msra.mxu1 %v47_v3  ;;  %p266_p0 = pnand %p265_p13, %p259_p10 }
  0x25   :  { %199 = vmatprep.mubr.msk.f32.mxu0 %vm58_vm0, %v43_v4  ;;  %202 = vmatprep.mubr.msk.f32.mxu1 %vm58_vm0, %v45_v5 }
  0x26   :  { %200 = vmatmul.mubr.msk.f32.vlgmr.msra.gmra.mxu0 %vm58_vm0, %v44_v6  ;;  %203 = vmatmul.mubr.msk.f32.vlgmr.msra.gmra.mxu1 %vm58_vm0, %v46_v7 }
  0xe6   :  { %v201_v9 = vpop.f32.mrf.mxu0  ;;  %v204_v10 = vpop.f32.mrf.mxu1 }
  0xe7   :  { %v143_v11 = vadd.f32 %v201_v9, %v178_v8  ;;  %v153_v12 = vadd.f32 %v204_v10, %v178_v8 }
  0xe8   :  { %v137_v13 = vpop.f32.mrf.mxu0  ;;  %v147_v14 = vpop.f32.mrf.mxu1 }
  0xe9   :  { %157 = vst.msk [vmem:[#allocation7 + $0x8] sm:$0xff] %vm58_vm0, %v143_v11  ;;  %159 = vst.msk [vmem:[#allocation7 + $0x18] sm:$0xff] %vm58_vm0, %v153_v12  ;;  %v138_v15 = vadd.f32 %v178_v8, %v137_v13  ;;  %v148_v16 = vadd.f32 %v178_v8, %v147_v14 }
  0xeb   :  { %156 = vst.msk [vmem:[#allocation7] sm:$0xff] %vm58_vm0, %v138_v15  ;;  %158 = vst.msk [vmem:[#allocation7 + $0x10] sm:$0xff] %vm58_vm0, %v148_v16 }
  0xec   :  { %269 = shalt.err (!%p266_p0)
}
  0xed   :  { %171 = dma.vmem_to_hbm [thread:$0]  %s166_s25, 512, %s341_s3, [#allocation4], %s285_s15, %s285_s15, %s286_s16  }
  0xee   :  { %282 = dma.done.wait [#allocation4], 512  }
  0xef   :  { %283 = vsyncadd [#allocation4], 4294966784 }
  0xf0   :  { %175 = vsyncpa [#allocation3], 1 }
  0xf1   :  { %176 = vsyncpa [#allocation6], 1 }
  0xf2   :  { %177 = vsyncpa [#allocation4], 1 }

</bundles_post_ra>
